<compile_context>
chip_gen: v6e
topology: v6e:2x2x1
jax: 0.10.0
libtpu: 0.0.40
codegen_flags: <defaults>
</compile_context>

<pallas_src>
import jax
import jax.numpy as jnp
from jax.experimental import pallas as pl
from jax.experimental.pallas import tpu as pltpu

_LANE = 128


def _cdiv(a, b):
    return -(-a // b)


def _round_up(a, m):
    return _cdiv(a, m) * m


def _round_down(a, m):
    return (a // m) * m


def _sublane_multiple(dtype):
    # 8 for 4-byte, 16 for 2-byte, 32 for 1-byte dtypes.
    return max(8, 32 // jnp.dtype(dtype).itemsize)


def _default_target_block_bytes():
    # v7x: 3.2 TB/s HBM -> a 2 MiB block is only ~1.25 us; use bigger blocks to
    # amortize the ~0.35 us per-grid-step overhead.  v5e/v6e: 2 MiB is enough.
    try:
        kind = jax.devices()[0].device_kind.lower()
    except Exception:
        return 2 << 20
    if "v7" in kind or "7x" in kind:
        return 4 << 20
    return 2 << 20


def _plan_blocks(seq, batch, cols_proc, itemsize, sub, three_d, target_bytes):
    """Pick (tq_seq, tc_cols): seq positions / processed columns per block."""
    row_align = 1 if three_d else sub
    sub_rows = _round_up(batch, sub) if three_d else batch
    per_seq = sub_rows * _round_up(cols_proc, _LANE) * itemsize  # padded bytes / seq pos

    cap = target_bytes // max(per_seq, 1)
    if cap >= row_align:
        # Full processed width fits: only tile rows.
        tc_cols = cols_proc
        tq_seq = max(min(cap, seq), 1)
        if row_align > 1:
            t = _round_down(tq_seq, row_align)
            tq_seq = t if t >= row_align else seq  # seq < sub -> full-dim block (legal)
    else:
        # Even `row_align` seq positions at full width exceed the budget ->
        # tile the feature axis with multiple-of-128 column blocks.
        tq_seq = max(min(row_align, seq), 1)
        rows_pad = (tq_seq * _round_up(batch, sub)) if three_d \
            else _round_up(tq_seq * batch, sub)
        tc_cols = _round_down(target_bytes // max(rows_pad * itemsize, 1), _LANE)
        tc_cols = max(tc_cols, _LANE)
        if cols_proc < _LANE or tc_cols >= cols_proc:
            tc_cols = cols_proc

    # Prefer >= 2 grid steps so v7x megacore can split the row axis.
    if _cdiv(seq, tq_seq) * _cdiv(cols_proc, tc_cols) < 2 and seq > row_align:
        cand = _round_up(_cdiv(seq, 2), row_align)
        if cand < seq:
            tq_seq = cand
    return tq_seq, tc_cols


def positional_embedding_forward(x, emb_table, *, target_block_bytes=None):
    """x: (seq, batch, d_model_x); emb_table: (max_len, d_forwards).

    Returns x with emb_table[arange(seq)] added to x[:, :, :d_forwards].
    Dropout in the module has p=0.0, i.e. identity.
    """
    seq, batch, d_last = x.shape
    max_len, d_fwd = emb_table.shape
    if seq > max_len:
        raise ValueError(f"seq_len {seq} exceeds max_len {max_len}")
    if d_fwd > d_last:
        raise ValueError(f"d_forwards {d_fwd} exceeds x feature dim {d_last}")
    if target_block_bytes is None:
        target_block_bytes = _default_target_block_bytes()

    dtype = x.dtype
    itemsize = jnp.dtype(dtype).itemsize
    sub = _sublane_multiple(dtype)

    # Columns the kernel actually reads/writes.  When d_forwards < d_model the
    # kernel is restricted to the first round_up(d_forwards, 128) columns and
    # the aliased output buffer keeps the remaining columns untouched.
    cols_proc = d_last if d_fwd >= d_last else min(d_last, _round_up(d_fwd, _LANE))

    # Positional rows actually needed; cast/pad only those.
    # TODO(synk): cache the cast / padded table at module init instead of per call.
    emb = emb_table[:seq]
    if emb.dtype != dtype:
        emb = emb.astype(dtype)
    if d_fwd < cols_proc:
        emb = jnp.pad(emb, ((0, 0), (0, cols_proc - d_fwd)))

    three_d = batch >= sub
    tq_seq, tc_cols = _plan_blocks(seq, batch, cols_proc, itemsize, sub,
                                   three_d, target_block_bytes)
    grid = (_cdiv(seq, tq_seq), _cdiv(cols_proc, tc_cols))

    # Explicit scoped-VMEM limit: in/out/emb blocks, double buffered, padded to
    # (sublane, lane) tiles, plus headroom.  Keep well under v7x's 64 MiB.
    col_pad = _round_up(tc_cols, _LANE) * itemsize
    if three_d:
        x_blk = tq_seq * _round_up(batch, sub) * col_pad
        e_blk = tq_seq * sub * col_pad
    else:
        x_blk = _round_up(tq_seq * batch, sub) * col_pad
        e_blk = _round_up(tq_seq, sub) * col_pad
    need = 2 * (2 * x_blk + e_blk) + x_blk  # +x_blk for a possible broadcast temp
    vmem_limit = int(min(max(2 * need + (2 << 20), 32 << 20), 48 << 20))

    compiler_params = pltpu.CompilerParams(
        dimension_semantics=("parallel", "parallel"),
        vmem_limit_bytes=vmem_limit,
    )

    if three_d:
        # batch >= sublane multiple: keep x 3-D; emb block is (tq_seq, 1, tc)
        # -> plain sublane-broadcast add, no reshape temporary.
        emb3 = emb[:, None, :]  # (seq, 1, cols_proc)

        def kernel(x_ref, e_ref, o_ref):
            o_ref[...] = x_ref[...] + e_ref[...]

        return pl.pallas_call(
            kernel,
            out_shape=jax.ShapeDtypeStruct((seq, batch, d_last), dtype),
            grid_spec=pltpu.PrefetchScalarGridSpec(
                num_scalar_prefetch=0,
                grid=grid,
                in_specs=[
                    pl.BlockSpec((tq_seq, batch, tc_cols), lambda i, j: (i, 0, j)),
                    pl.BlockSpec((tq_seq, 1, tc_cols), lambda i, j: (i, 0, j)),
                ],
                out_specs=pl.BlockSpec((tq_seq, batch, tc_cols),
                                       lambda i, j: (i, 0, j)),
            ),
            compiler_params=compiler_params,
            # Semantically x += PE: in place when the caller donates x; the
            # untouched columns (cols_proc..d_last) stay valid either way.
            input_output_aliases={0: 0},
        )(x, emb3)

    # batch < sublane multiple: flatten (seq, batch) -> rows for full sublane
    # occupancy (free view: row-major, sequence-major layout).
    # TODO(synk): when d_model < 128, folding batch / seq groups into the lane
    # axis with a pre-tiled table would give lane-dense stores; skipped since it
    # needs an extra x-sized HBM slab per distinct batch size.
    rows = seq * batch
    tq_rows = tq_seq * batch
    x2d = x.reshape(rows, d_last)

    def kernel(x_ref, e_ref, o_ref):
        e = e_ref[...]                                   # (tq_seq, tc_cols)
        if batch == 1:
            o_ref[...] = x_ref[...] + e
        else:
            # Replicate each PE row `batch` times (row s*batch + b <- PE[s]).
            e_rep = jnp.broadcast_to(e[:, None, :], (tq_seq, batch, tc_cols))
            o_ref[...] = x_ref[...] + e_rep.reshape(tq_rows, tc_cols)

    out2d = pl.pallas_call(
        kernel,
        out_shape=jax.ShapeDtypeStruct((rows, d_last), dtype),
        grid_spec=pltpu.PrefetchScalarGridSpec(
            num_scalar_prefetch=0,
            grid=grid,
            in_specs=[
                pl.BlockSpec((tq_rows, tc_cols), lambda i, j: (i, j)),
                pl.BlockSpec((tq_seq, tc_cols), lambda i, j: (i, j)),
            ],
            out_specs=pl.BlockSpec((tq_rows, tc_cols), lambda i, j: (i, j)),
        ),
        compiler_params=compiler_params,
        input_output_aliases={0: 0},
    )(x2d, emb)
    return out2d.reshape(seq, batch, d_last)


if __name__ == "__main__":
    key = jax.random.PRNGKey(0)

    def reference(x, emb_table):
        seq = x.shape[0]
        d_fwd = emb_table.shape[1]
        y = emb_table[:seq].astype(x.dtype)[:, None, :]
        return x.at[:, :, :d_fwd].add(y)

    def run_case(k, seq, batch, d_x, d_fwd, max_len):
        kx, kw = jax.random.split(k)
        x = jax.random.normal(kx, (seq, batch, d_x), dtype=jnp.float32)
        # nn.init.normal_(weight, mean=0.0, std=0.02)
        emb = 0.02 * jax.random.normal(kw, (max_len, d_fwd), dtype=jnp.float32)
        out = jax.block_until_ready(positional_embedding_forward(x, emb))
        ref = reference(x, emb)
        assert out.shape == x.shape and out.dtype == x.dtype
        assert jnp.allclose(out, ref, atol=1e-6, rtol=1e-6), (seq, batch, d_x, d_fwd)

    k1, k2, k3 = jax.random.split(key, 3)
    # Module-consistent small shapes: seq=8, batch=2, d_model=d_forwards=32, max_len=64.
    run_case(k1, seq=8, batch=2, d_x=32, d_fwd=32, max_len=64)
    # batch >= sublane multiple -> 3-D sublane-broadcast add path.
    run_case(k2, seq=16, batch=8, d_x=128, d_fwd=128, max_len=32)
    # d_forwards < d_model: kernel touches only the first 128 columns; the
    # aliased output keeps the remaining columns of x intact.
    run_case(k3, seq=8, batch=2, d_x=256, d_fwd=128, max_len=16)

    print("KERNEL_OK")
</pallas_src>

<mosaic_0001>
module attributes {stable_mosaic.version = 11 : i64} {
  func.func @kernel(%arg0: i32, %arg1: i32, %arg2: memref<16x32xf32, #tpu.memory_space<vmem>>, %arg3: memref<8x32xf32, #tpu.memory_space<vmem>>, %arg4: memref<16x32xf32, #tpu.memory_space<vmem>>) attributes {dimension_semantics = [#tpu.dimension_semantics<parallel>, #tpu.dimension_semantics<parallel>], iteration_bounds = array<i64: 1, 1>, scalar_prefetch = 0 : i64, scratch_operands = 0 : i64, tpu.core_type = #tpu.core_type<tc>, window_params = [{transform_indices = @transform_0, window_bounds = array<i64: 16, 32>}, {transform_indices = @transform_1, window_bounds = array<i64: 8, 32>}, {transform_indices = @transform_2, window_bounds = array<i64: 16, 32>}]} {
    %c0 = arith.constant 0 : index
    %c0_0 = arith.constant 0 : index
    %0 = vector.load %arg3[%c0, %c0_0] : memref<8x32xf32, #tpu.memory_space<vmem>>, vector<8x32xf32>
    %1 = vector.shape_cast %0 : vector<8x32xf32> to vector<8x1x32xf32>
    %2 = vector.shape_cast %1 : vector<8x1x32xf32> to vector<8x1x32xf32>
    %3 = vector.broadcast %2 : vector<8x1x32xf32> to vector<8x2x32xf32>
    %c0_1 = arith.constant 0 : index
    %c0_2 = arith.constant 0 : index
    %4 = vector.load %arg2[%c0_1, %c0_2] : memref<16x32xf32, #tpu.memory_space<vmem>>, vector<16x32xf32>
    %5 = vector.shape_cast %3 : vector<8x2x32xf32> to vector<16x32xf32>
    %6 = arith.addf %4, %5 : vector<16x32xf32>
    %c0_3 = arith.constant 0 : index
    %c0_4 = arith.constant 0 : index
    %7 = vector.load %arg4[%c0_3, %c0_4] : memref<16x32xf32, #tpu.memory_space<vmem>>, vector<16x32xf32>
    tpu.vector_store %arg4[%c0_3, %c0_4], %6 {strides = array<i32>} : memref<16x32xf32, #tpu.memory_space<vmem>>, vector<16x32xf32>,
    return
  }
  func.func @transform_0(%arg0: i32, %arg1: i32) -> (i32, i32) {
    %c0_i32 = arith.constant 0 : i32
    return %arg0, %arg1 : i32, i32
  }
  func.func @transform_1(%arg0: i32, %arg1: i32) -> (i32, i32) {
    %c0_i32 = arith.constant 0 : i32
    return %arg0, %arg1 : i32, i32
  }
  func.func @transform_2(%arg0: i32, %arg1: i32) -> (i32, i32) {
    %c0_i32 = arith.constant 0 : i32
    return %arg0, %arg1 : i32, i32
  }
}

</mosaic_0001>

<bundles_post_ra>
// kernel: tpu_custom_call.1
= control target key start
LH: loop header
LB: loop body
LE: loop exit
PB: predicated region body
PF: predicated region fallthrough
CT: control target
= control target key end

     0   :  { %7 = vsyncpa [#allocation3], 0  ;;  %s255_s0 = inlined_call_operand.hbm [shape: f32[16,32], index: 0, kind: input, shape index: {}, may-alias: {0,2}]   ;;  %s256_s1 = inlined_call_operand.vmem [shape: f32[8,32], index: 1, kind: input, shape index: {}]   ;;  %s257_s2 = inlined_call_operand.hbm [shape: f32[16,32], index: 2, kind: output, shape index: {}, may-alias: {0,2}]  }
   0x1   :  { %8 = vsyncpa [#allocation4], 0  ;;  %s219_s9 = smov [#allocation2]  }
   0x2   :  { %s14_s10 = sshll.u32 %s219_s9, 4  ;;  %s15_s10 = int_to_ptr.vmem [resolvable:$true] %s14_s10 }
   0x3   :  { %s183_s11 = scalar_lea.vmem %s15_s10, 256  ;;  %p188_p1 = scmp.lt.s32.totalorder %s15_s10, %s15_s10 }
   0x4   :  { %p184_p0 = scmp.ne.s32.totalorder %s15_s10, %s183_s11  ;;  %p189_p2 = scmp.lt.s32.totalorder %s183_s11, %s183_s11 }
   0x6   :  { %p190_p3 = por %p189_p2, %p188_p1 }
   0x8   :  { %p191_p4 = pnand %p190_p3, %p184_p0 }
   0xa   :  { %194 = shalt.err (!%p191_p4)
}
   0xb   :  { %s220_s12 = smov 128   ;;  %s221_s13 = smov 8  }
   0xc   :  { %20 = dma.hbm_to_vmem [thread:$0]  %s255_s0, 256, %s15_s10, [#allocation3], %s220_s12, %s220_s12, %s221_s13  }
   0xd   :  { %215 = dma.done.wait [#allocation3], 256  }
   0xe   :  { %216 = vsyncadd [#allocation3], 4294967040  ;;  %v32_v0 = vlaneseq  ;;  %v222_v1 = vmov 1966171168   ;;  %v223_v6 = vmov 1983009808  }
   0xf   :  { %v30_v2 = vunpack.c.l.s4 %v222_v1  ;;  %v114_v7 = vunpack.c.l.s4 %v223_v6  ;;  %v26_v8 = vld [vmem:[%s256_s1] sm:$0xff]  ;;  %vm149_vm0 = vcmask 261120   ;;  %v110_v43 = vld [vmem:[#allocation2 + $0x8] sm:$0xff]  ;;  %s224_s0 = smov [#allocation5]  }
  0x10   :  { %v33_v3 = vshrl.u32 %v32_v0, 7  ;;  %v28_v11 = vcombine.high %v26_v8, %v26_v8  ;;  %v109_v40 = vld [vmem:[#allocation2] sm:$0xff]  ;;  %s157_s1 = sshll.u32 %s224_s0, 4  ;;  %s158_s1 = int_to_ptr.vmem [resolvable:$true] %s157_s1 }
  0x11   :  { %v31_v4 = vunpack.c.0.s8 %v30_v2  ;;  %v115_v12 = vunpack.c.0.s8 %v114_v7  ;;  %s195_s18 = scalar_lea.vmem %s158_s1, 256  ;;  %p200_p6 = scmp.lt.s32.totalorder %s158_s1, %s158_s1 }
  0x12   :  { %v79_v10 = vsub.s32 0, %v33_v3  ;;  %p196_p5 = scmp.ne.s32.totalorder %s158_s1, %s195_s18  ;;  %p201_p7 = scmp.lt.s32.totalorder %s195_s18, %s195_s18 }
  0x13   :  { %v34_v5 = vsub.s32 %v31_v4, %v33_v3  ;;  %v118_v20 = vsub.s32 %v115_v12, %v33_v3 }
  0x14   :  { %p202_p8 = por %p201_p7, %p200_p6 }
  0x15   :  { %v35_v9 = vrot.slane %v26_v8, %v34_v5  ;;  %v42_v15 = vrot.slane %v28_v11, %v34_v5 }
  0x16   :  { %p203_p9 = pnand %p202_p8, %p196_p5 }
  0x17   :  { %v43_v13 = vcombine.high %v35_v9, %v35_v9  ;;  %v51_v14 = vrot.slane %v35_v9, %v34_v5  ;;  %v44_v19 = vcombine.high %v42_v15, %v42_v15  ;;  %v58_v21 = vrot.slane %v42_v15, %v34_v5 }
  0x19   :  { %v65_v16 = vrot.slane %v43_v13, %v34_v5  ;;  %v73_v17 = vcombine.high %v51_v14, %v51_v14  ;;  %v80_v18 = vrot.slane %v51_v14, %v79_v10  ;;  %v72_v25 = vrot.slane %v44_v19, %v34_v5 }
  0x1a   :  { %v74_v26 = vcombine.high %v58_v21, %v58_v21  ;;  %v96_v27 = vrot.slane %v58_v21, %v79_v10 }
  0x1b   :  { %v75_v22 = vcombine.high %v65_v16, %v65_v16  ;;  %v84_v23 = vrot.slane %v65_v16, %v79_v10  ;;  %v88_v24 = vrot.slane %v73_v17, %v79_v10  ;;  %v76_v30 = vcombine.high %v72_v25, %v72_v25 }
  0x1c   :  { %v100_v31 = vrot.slane %v72_v25, %v79_v10  ;;  %v104_v32 = vrot.slane %v74_v26, %v79_v10 }
  0x1d   :  { %v92_v28 = vrot.slane %v75_v22, %v79_v10  ;;  %v111_v29 = vcombine.low %v80_v18, %v84_v23  ;;  %v108_v35 = vrot.slane %v76_v30, %v79_v10 }
  0x1e   :  { %v128_v36 = vcombine.low %v96_v27, %v100_v31 }
  0x1f   :  { %v112_v33 = vcombine.low %v88_v24, %v92_v28  ;;  %v119_v34 = vrot.slane %v111_v29, %v118_v20  ;;  %v129_v38 = vcombine.low %v104_v32, %v108_v35 }
  0x20   :  { %v136_v39 = vrot.slane %v128_v36, %v118_v20 }
  0x21   :  { %v126_v37 = vrot.slane %v112_v33, %v118_v20  ;;  %v143_v42 = vrot.slane %v129_v38, %v118_v20 }
  0x23   :  { %v127_v41 = vcombine.low %v119_v34, %v126_v37  ;;  %v144_v45 = vcombine.low %v136_v39, %v143_v42 }
  0x25   :  { %v147_v44 = vadd.f32 %v127_v41, %v109_v40  ;;  %v148_v46 = vadd.f32 %v144_v45, %v110_v43 }
  0x27   :  { %150 = vst.msk [vmem:[#allocation5] sm:$0xff] %vm149_vm0, %v147_v44  ;;  %151 = vst.msk [vmem:[#allocation5 + $0x8] sm:$0xff] %vm149_vm0, %v148_v46 }
  0x28   :  { %206 = shalt.err (!%p203_p9)
}
  0x29   :  { %163 = dma.vmem_to_hbm [thread:$0]  %s158_s1, 256, %s257_s2, [#allocation4], %s220_s12, %s220_s12, %s221_s13  }
  0x2a   :  { %217 = dma.done.wait [#allocation4], 256  }
  0x2b   :  { %218 = vsyncadd [#allocation4], 4294967040 }
  0x2c   :  { %167 = vsyncpa [#allocation3], 1 }
  0x2d   :  { %168 = vsyncpa [#allocation4], 1 }

</bundles_post_ra>
